<compile_context>
chip_gen: v5e
topology: v5e:2x2
jax: 0.10.0
libtpu: 0.0.40
codegen_flags: <defaults>
</compile_context>

<pallas_src>
import functools

import jax
import jax.numpy as jnp
from jax import lax
from jax.experimental import pallas as pl
from jax.experimental.pallas import tpu as pltpu

PAD = 128  # lane halo on each side of H*W: aligned writes, covers the +-(W+1) tap offsets


def mbconv_kernel(x_ref, w1_ref, b1_ref, wd_ref, bd_ref, w2_ref, b2_ref,
                  o_ref, ypad_ref, *, H, W):
    # x_ref   : (1, Cin, H*W)        channel-major image for this batch element
    # w1_ref  : (Cmid, Cin)          1x1 expand weights (transposed), BN1 scale folded
    # b1_ref  : (Cmid, 1)            BN1 shift
    # wd_ref  : (Cmid, 9)            3x3 depthwise weights (tap = 3*dh+dw), BN2 folded
    # bd_ref  : (Cmid, 1)            BN2 shift
    # w2_ref  : (Cout, Cmid)         1x1 project weights (transposed), BN3 scale folded
    # b2_ref  : (Cout, 1)            BN3 shift
    # o_ref   : (1, Cout, H*W)       lane-dense output block of (N, Cout, H*W)
    # ypad_ref: (Cmid, H*W + 2*PAD)  f32 scratch: expanded activations + zero lane halo
    HW = H * W
    cmid = w1_ref.shape[0]

    # Zero only the halo pads; the interior is fully overwritten below.  Image
    # rows -1 and H fall into these pads, giving the conv's top/bottom zero
    # padding for free.  (Zeroed every step: with "parallel" semantics a core
    # may never see grid step 0, so "init once" would be unsafe.)
    ypad_ref[:, 0:PAD] = jnp.zeros((cmid, PAD), jnp.float32)
    ypad_ref[:, PAD + HW:PAD + HW + PAD] = jnp.zeros((cmid, PAD), jnp.float32)

    # ---- inverted_conv: 1x1 expand + BN bias + relu6 ------------------------
    y = jnp.dot(w1_ref[...], x_ref[0], preferred_element_type=jnp.float32)
    y = jnp.clip(y + b1_ref[...], 0.0, 6.0)                    # (Cmid, HW) f32
    ypad_ref[:, PAD:PAD + HW] = y                               # lane-aligned store

    # ---- depth_conv: 3x3 depthwise + BN bias + relu6 (VPU, f32) -------------
    # Flattened position q = h*W + w; tap (dh, dw) reads q + (dh-1)*W + (dw-1).
    # Left/right image borders need a column mask (the flattened layout wraps
    # into the neighbouring row); top/bottom borders land in the zero pads.
    col = lax.broadcasted_iota(jnp.int32, (1, HW), 1) % W
    wdv = wd_ref[...]                                           # single (Cmid, 9) load
    acc = jnp.zeros((cmid, HW), jnp.float32)
    for dw in range(3):
        part = jnp.zeros((cmid, HW), jnp.float32)
        for dh in range(3):
            s0 = PAD + (dh - 1) * W + (dw - 1)                  # static lane offset
            k = 3 * dh + dw
            part = part + ypad_ref[:, s0:s0 + HW] * wdv[:, k:k + 1]
        if dw == 0:
            part = jnp.where(col != 0, part, 0.0)               # image column -1 -> 0
        elif dw == 2:
            part = jnp.where(col != W - 1, part, 0.0)           # image column W  -> 0
        acc = acc + part
    zmid = jnp.clip(acc + bd_ref[...], 0.0, 6.0)                # (Cmid, HW) f32

    # ---- point_conv: 1x1 project + BN bias (no activation) ------------------
    out = jnp.dot(w2_ref[...], zmid.astype(w2_ref.dtype),
                  preferred_element_type=jnp.float32)
    out = out + b2_ref[...]                                     # (Cout, HW)
    o_ref[...] = out[None].astype(o_ref.dtype)                  # lane-dense store


def mbconv(x_nchw, w1, s1, b1, wd, sd, bd, w2, s2, b2,
           *, matmul_dtype=jnp.bfloat16):
    """x_nchw: (N, Cin, H, W) float32.  Returns (N, Cout, H, W) float32."""
    N, Cin, H, W = x_nchw.shape
    Cmid = w1.shape[1]
    Cout = w2.shape[1]
    HW = H * W
    assert HW % 128 == 0, "H*W must be a multiple of 128 (lane tile)"
    assert PAD > W, "lane pad must cover the +-(W+1) depthwise tap offsets"

    # Channel-major (NCHW-native) I/O: metadata-only reshape, no transposes.
    x = x_nchw.reshape(N, Cin, HW).astype(matmul_dtype)

    # Fold BN scales into the (transposed) conv weights once; only per-channel
    # bias adds remain in the kernel.
    w1t = (w1 * s1[None, :]).T.astype(matmul_dtype)             # (Cmid, Cin)
    wdt = (wd * sd[None, None, :]).reshape(9, Cmid).T.astype(jnp.float32)  # (Cmid, 9)
    w2t = (w2 * s2[None, :]).T.astype(matmul_dtype)             # (Cout, Cmid)
    b1c = b1.reshape(Cmid, 1).astype(jnp.float32)
    bdc = bd.reshape(Cmid, 1).astype(jnp.float32)
    b2c = b2.reshape(Cout, 1).astype(jnp.float32)

    kernel = functools.partial(mbconv_kernel, H=H, W=W)

    out = pl.pallas_call(
        kernel,
        # f32 output to match reference semantics; bf16 would halve writeback
        # bytes if downstream accepts it.
        out_shape=jax.ShapeDtypeStruct((N, Cout, HW), jnp.float32),
        grid_spec=pltpu.PrefetchScalarGridSpec(
            num_scalar_prefetch=0,
            grid=(N,),
            in_specs=[
                pl.BlockSpec((1, Cin, HW), lambda b: (b, 0, 0)),
                pl.BlockSpec((Cmid, Cin), lambda b: (0, 0)),
                pl.BlockSpec((Cmid, 1), lambda b: (0, 0)),
                pl.BlockSpec((Cmid, 9), lambda b: (0, 0)),
                pl.BlockSpec((Cmid, 1), lambda b: (0, 0)),
                pl.BlockSpec((Cout, Cmid), lambda b: (0, 0)),
                pl.BlockSpec((Cout, 1), lambda b: (0, 0)),
            ],
            out_specs=pl.BlockSpec((1, Cout, HW), lambda b: (b, 0, 0)),
            scratch_shapes=[pltpu.VMEM((Cmid, HW + 2 * PAD), jnp.float32)],
        ),
        compiler_params=pltpu.CompilerParams(
            dimension_semantics=("parallel",),
            vmem_limit_bytes=32 * 1024 * 1024),
    )(x, w1t, b1c, wdt, bdc, w2t, b2c)

    return out.reshape(N, Cout, H, W)                           # metadata-only


def reference(x_nchw, w1, s1, b1, wd, sd, bd, w2, s2, b2):
    """Pure-JAX f32 reference of the MBConv forward pass (for validation)."""
    x = jnp.transpose(x_nchw, (0, 2, 3, 1))
    y = jnp.einsum("nhwc,cd->nhwd", x, w1, precision=lax.Precision.HIGHEST)
    y = jnp.clip(y * s1 + b1, 0.0, 6.0)
    z = lax.conv_general_dilated(
        y, wd.reshape(3, 3, 1, -1), window_strides=(1, 1),
        padding=((1, 1), (1, 1)),
        dimension_numbers=("NHWC", "HWIO", "NHWC"),
        feature_group_count=wd.shape[-1],
        precision=lax.Precision.HIGHEST)
    z = jnp.clip(z * sd + bd, 0.0, 6.0)
    o = jnp.einsum("nhwc,cd->nhwd", z, w2, precision=lax.Precision.HIGHEST)
    o = o * s2 + b2
    return jnp.transpose(o, (0, 3, 1, 2))


def make_bn_fold(c, keys, eps=1e-5):
    """Deterministic eval-mode BN params folded into (scale, shift)."""
    kg, kb, km, kv = keys
    gamma = 1.0 + 0.1 * jax.random.normal(kg, (c,), jnp.float32)
    beta = 0.1 * jax.random.normal(kb, (c,), jnp.float32)
    mean = 0.1 * jax.random.normal(km, (c,), jnp.float32)
    var = jnp.abs(1.0 + 0.1 * jax.random.normal(kv, (c,), jnp.float32))
    scale = gamma / jnp.sqrt(var + eps)
    shift = beta - mean * scale
    return scale, shift


if __name__ == "__main__":
    key = jax.random.PRNGKey(0)
    ks = jax.random.split(key, 16)

    # Module config: in_channels=4, out_channels=4, kernel_size=3, stride=1,
    # expand_ratio=6 -> mid_channels=24.
    N, Cin, H, W = 2, 4, 16, 16
    Cmid = round(Cin * 6)     # 24
    Cout = 4

    x_nchw = jax.random.normal(ks[0], (N, Cin, H, W), jnp.float32)

    # Conv weights: 1x1 expand (Cin,Cmid), 3x3 depthwise (3,3,Cmid), 1x1
    # project (Cmid,Cout).
    w1 = 0.1 * jax.random.normal(ks[1], (Cin, Cmid), jnp.float32)
    wd = 0.1 * jax.random.normal(ks[2], (3, 3, Cmid), jnp.float32)
    w2 = 0.1 * jax.random.normal(ks[3], (Cmid, Cout), jnp.float32)

    # Folded BatchNorm parameters (eval-mode running statistics).
    # TODO(synk): training-mode BN (batch statistics) is not implemented;
    #             the kernel uses eval-mode folded affine BN.
    s1, b1 = make_bn_fold(Cmid, ks[4:8])
    sd, bd = make_bn_fold(Cmid, ks[8:12])
    s2, b2 = make_bn_fold(Cout, ks[12:16])

    ref = reference(x_nchw, w1, s1, b1, wd, sd, bd, w2, s2, b2)

    # f32 path: tight check of the kernel structure.
    out_f32 = mbconv(x_nchw, w1, s1, b1, wd, sd, bd, w2, s2, b2,
                     matmul_dtype=jnp.float32)
    out_f32 = jax.block_until_ready(out_f32)
    assert out_f32.shape == (N, Cout, H, W), out_f32.shape
    assert jnp.allclose(out_f32, ref, atol=1e-3, rtol=1e-3), (
        float(jnp.max(jnp.abs(out_f32 - ref))))

    # bf16-operand path (v6e/v7x fast path): f32 accumulation, looser tol.
    out_bf16 = mbconv(x_nchw, w1, s1, b1, wd, sd, bd, w2, s2, b2,
                      matmul_dtype=jnp.bfloat16)
    out_bf16 = jax.block_until_ready(out_bf16)
    assert out_bf16.shape == (N, Cout, H, W), out_bf16.shape
    assert jnp.allclose(out_bf16, ref, atol=3e-2, rtol=3e-2), (
        float(jnp.max(jnp.abs(out_bf16 - ref))))

    print("KERNEL_OK")
</pallas_src>

<mosaic_0001>
module attributes {stable_mosaic.version = 11 : i64} {
  func.func @mbconv_kernel(%arg0: i32, %arg1: memref<1x4x256xf32, #tpu.memory_space<vmem>>, %arg2: memref<24x4xf32, #tpu.memory_space<vmem>>, %arg3: memref<24x1xf32, #tpu.memory_space<vmem>>, %arg4: memref<24x9xf32, #tpu.memory_space<vmem>>, %arg5: memref<24x1xf32, #tpu.memory_space<vmem>>, %arg6: memref<4x24xf32, #tpu.memory_space<vmem>>, %arg7: memref<4x1xf32, #tpu.memory_space<vmem>>, %arg8: memref<1x4x256xf32, #tpu.memory_space<vmem>>, %arg9: memref<24x512xf32, #tpu.memory_space<vmem>>) attributes {dimension_semantics = [#tpu.dimension_semantics<parallel>], iteration_bounds = array<i64: 2>, scalar_prefetch = 0 : i64, scratch_operands = 1 : i64, tpu.core_type = #tpu.core_type<tc>, window_params = [{transform_indices = @transform_0, window_bounds = array<i64: 1, 4, 256>}, {pipeline_mode = #tpu.pipeline_mode<synchronous>, transform_indices = @transform_1, window_bounds = array<i64: 24, 4>}, {pipeline_mode = #tpu.pipeline_mode<synchronous>, transform_indices = @transform_2, window_bounds = array<i64: 24, 1>}, {pipeline_mode = #tpu.pipeline_mode<synchronous>, transform_indices = @transform_3, window_bounds = array<i64: 24, 9>}, {pipeline_mode = #tpu.pipeline_mode<synchronous>, transform_indices = @transform_4, window_bounds = array<i64: 24, 1>}, {pipeline_mode = #tpu.pipeline_mode<synchronous>, transform_indices = @transform_5, window_bounds = array<i64: 4, 24>}, {pipeline_mode = #tpu.pipeline_mode<synchronous>, transform_indices = @transform_6, window_bounds = array<i64: 4, 1>}, {transform_indices = @transform_7, window_bounds = array<i64: 1, 4, 256>}]} {
    %cst = arith.constant 0.000000e+00 : f32
    %0 = vector.broadcast %cst : f32 to vector<24x128xf32>
    %c0 = arith.constant 0 : index
    %c0_0 = arith.constant 0 : index
    %1 = vector.load %arg9[%c0, %c0_0] : memref<24x512xf32, #tpu.memory_space<vmem>>, vector<24x128xf32>
    tpu.vector_store %arg9[%c0, %c0_0], %0 {strides = array<i32>} : memref<24x512xf32, #tpu.memory_space<vmem>>, vector<24x128xf32>,
    %cst_1 = arith.constant 0.000000e+00 : f32
    %2 = vector.broadcast %cst_1 : f32 to vector<24x128xf32>
    %c0_2 = arith.constant 0 : index
    %c384 = arith.constant 384 : index
    %3 = vector.load %arg9[%c0_2, %c384] : memref<24x512xf32, #tpu.memory_space<vmem>>, vector<24x128xf32>
    tpu.vector_store %arg9[%c0_2, %c384], %2 {strides = array<i32>} : memref<24x512xf32, #tpu.memory_space<vmem>>, vector<24x128xf32>,
    %c0_3 = arith.constant 0 : index
    %c0_4 = arith.constant 0 : index
    %4 = vector.load %arg2[%c0_3, %c0_4] : memref<24x4xf32, #tpu.memory_space<vmem>>, vector<24x4xf32>
    %c0_5 = arith.constant 0 : index
    %c0_6 = arith.constant 0 : index
    %c0_7 = arith.constant 0 : index
    %5 = vector.load %arg1[%c0_5, %c0_6, %c0_7] : memref<1x4x256xf32, #tpu.memory_space<vmem>>, vector<1x4x256xf32>
    %6 = vector.shape_cast %5 : vector<1x4x256xf32> to vector<4x256xf32>
    %cst_8 = arith.constant dense<0.000000e+00> : vector<24x256xf32>
    %7 = tpu.matmul %4, %6, %cst_8 {dimension_numbers = #tpu.dot_dimension_numbers<[1], [0], [0], [1], [0, 0, 1, 1], [], []>} : vector<24x4xf32>, vector<4x256xf32>, vector<24x256xf32> -> vector<24x256xf32>
    %c0_9 = arith.constant 0 : index
    %c0_10 = arith.constant 0 : index
    %8 = vector.load %arg3[%c0_9, %c0_10] : memref<24x1xf32, #tpu.memory_space<vmem>>, vector<24x1xf32>
    %9 = vector.broadcast %8 : vector<24x1xf32> to vector<24x256xf32>
    %10 = arith.addf %7, %9 : vector<24x256xf32>
    %cst_11 = arith.constant 0.000000e+00 : f32
    %cst_12 = arith.constant 6.000000e+00 : f32
    %11 = vector.broadcast %cst_11 : f32 to vector<24x256xf32>
    %12 = arith.maximumf %11, %10 : vector<24x256xf32>
    %13 = vector.broadcast %cst_12 : f32 to vector<24x256xf32>
    %14 = arith.minimumf %13, %12 : vector<24x256xf32>
    %c0_13 = arith.constant 0 : index
    %c128 = arith.constant 128 : index
    %15 = vector.load %arg9[%c0_13, %c128] : memref<24x512xf32, #tpu.memory_space<vmem>>, vector<24x256xf32>
    tpu.vector_store %arg9[%c0_13, %c128], %14 {strides = array<i32>} : memref<24x512xf32, #tpu.memory_space<vmem>>, vector<24x256xf32>,
    %16 = tpu.iota {dimensions = array<i32: 1>} : vector<1x256xi32>
    %c16_i32 = arith.constant 16 : i32
    %c0_i32 = arith.constant 0 : i32
    %17 = arith.cmpi eq, %c16_i32, %c0_i32 : i32
    %c1_i32 = arith.constant 1 : i32
    %18 = arith.select %17, %c1_i32, %c16_i32 : i32
    %19 = vector.broadcast %18 : i32 to vector<1x256xi32>
    %20 = arith.remsi %16, %19 : vector<1x256xi32>
    %c0_i32_14 = arith.constant 0 : i32
    %21 = vector.broadcast %c0_i32_14 : i32 to vector<1x256xi32>
    %22 = arith.cmpi ne, %20, %21 : vector<1x256xi32>
    %c0_i32_15 = arith.constant 0 : i32
    %23 = vector.broadcast %c0_i32_15 : i32 to vector<1x256xi32>
    %24 = arith.cmpi slt, %20, %23 : vector<1x256xi32>
    %c0_i32_16 = arith.constant 0 : i32
    %25 = arith.cmpi slt, %18, %c0_i32_16 : i32
    %26 = vector.broadcast %25 : i1 to vector<1x256xi1>
    %27 = vector.broadcast %26 : vector<1x256xi1> to vector<1x256xi1>
    %28 = arith.xori %24, %27 : vector<1x256xi1>
    %29 = arith.andi %28, %22 : vector<1x256xi1>
    %30 = vector.broadcast %18 : i32 to vector<1x256xi32>
    %31 = arith.addi %20, %30 : vector<1x256xi32>
    %32 = arith.select %29, %31, %20 : vector<1x256xi1>, vector<1x256xi32>
    %c0_17 = arith.constant 0 : index
    %c0_18 = arith.constant 0 : index
    %33 = vector.load %arg4[%c0_17, %c0_18] : memref<24x9xf32, #tpu.memory_space<vmem>>, vector<24x9xf32>
    %cst_19 = arith.constant 0.000000e+00 : f32
    %34 = vector.broadcast %cst_19 : f32 to vector<24x256xf32>
    %cst_20 = arith.constant 0.000000e+00 : f32
    %35 = vector.broadcast %cst_20 : f32 to vector<24x256xf32>
    %c0_21 = arith.constant 0 : index
    %c111 = arith.constant 111 : index
    %36 = vector.load %arg9[%c0_21, %c111] : memref<24x512xf32, #tpu.memory_space<vmem>>, vector<24x256xf32>
    %37 = vector.extract_strided_slice %33 {offsets = [0, 0], sizes = [24, 1], strides = [1, 1]} : vector<24x9xf32> to vector<24x1xf32>
    %38 = vector.broadcast %37 : vector<24x1xf32> to vector<24x256xf32>
    %39 = arith.mulf %36, %38 : vector<24x256xf32>
    %40 = arith.addf %35, %39 : vector<24x256xf32>
    %c0_22 = arith.constant 0 : index
    %c127 = arith.constant 127 : index
    %41 = vector.load %arg9[%c0_22, %c127] : memref<24x512xf32, #tpu.memory_space<vmem>>, vector<24x256xf32>
    %42 = vector.extract_strided_slice %33 {offsets = [0, 3], sizes = [24, 1], strides = [1, 1]} : vector<24x9xf32> to vector<24x1xf32>
    %43 = vector.broadcast %42 : vector<24x1xf32> to vector<24x256xf32>
    %44 = arith.mulf %41, %43 : vector<24x256xf32>
    %45 = arith.addf %40, %44 : vector<24x256xf32>
    %c0_23 = arith.constant 0 : index
    %c143 = arith.constant 143 : index
    %46 = vector.load %arg9[%c0_23, %c143] : memref<24x512xf32, #tpu.memory_space<vmem>>, vector<24x256xf32>
    %47 = vector.extract_strided_slice %33 {offsets = [0, 6], sizes = [24, 1], strides = [1, 1]} : vector<24x9xf32> to vector<24x1xf32>
    %48 = vector.broadcast %47 : vector<24x1xf32> to vector<24x256xf32>
    %49 = arith.mulf %46, %48 : vector<24x256xf32>
    %50 = arith.addf %45, %49 : vector<24x256xf32>
    %c0_i32_24 = arith.constant 0 : i32
    %51 = vector.broadcast %c0_i32_24 : i32 to vector<1x256xi32>
    %52 = arith.cmpi ne, %32, %51 : vector<1x256xi32>
    %cst_25 = arith.constant 0.000000e+00 : f32
    %53 = vector.shape_cast %52 : vector<1x256xi1> to vector<1x256xi1>
    %54 = vector.broadcast %53 : vector<1x256xi1> to vector<24x256xi1>
    %55 = vector.broadcast %cst_25 : f32 to vector<24x256xf32>
    %56 = arith.select %54, %50, %55 : vector<24x256xi1>, vector<24x256xf32>
    %57 = arith.addf %34, %56 : vector<24x256xf32>
    %cst_26 = arith.constant 0.000000e+00 : f32
    %58 = vector.broadcast %cst_26 : f32 to vector<24x256xf32>
    %c0_27 = arith.constant 0 : index
    %c112 = arith.constant 112 : index
    %59 = vector.load %arg9[%c0_27, %c112] : memref<24x512xf32, #tpu.memory_space<vmem>>, vector<24x256xf32>
    %60 = vector.extract_strided_slice %33 {offsets = [0, 1], sizes = [24, 1], strides = [1, 1]} : vector<24x9xf32> to vector<24x1xf32>
    %61 = vector.broadcast %60 : vector<24x1xf32> to vector<24x256xf32>
    %62 = arith.mulf %59, %61 : vector<24x256xf32>
    %63 = arith.addf %58, %62 : vector<24x256xf32>
    %c0_28 = arith.constant 0 : index
    %c128_29 = arith.constant 128 : index
    %64 = vector.load %arg9[%c0_28, %c128_29] : memref<24x512xf32, #tpu.memory_space<vmem>>, vector<24x256xf32>
    %65 = vector.extract_strided_slice %33 {offsets = [0, 4], sizes = [24, 1], strides = [1, 1]} : vector<24x9xf32> to vector<24x1xf32>
    %66 = vector.broadcast %65 : vector<24x1xf32> to vector<24x256xf32>
    %67 = arith.mulf %64, %66 : vector<24x256xf32>
    %68 = arith.addf %63, %67 : vector<24x256xf32>
    %c0_30 = arith.constant 0 : index
    %c144 = arith.constant 144 : index
    %69 = vector.load %arg9[%c0_30, %c144] : memref<24x512xf32, #tpu.memory_space<vmem>>, vector<24x256xf32>
    %70 = vector.extract_strided_slice %33 {offsets = [0, 7], sizes = [24, 1], strides = [1, 1]} : vector<24x9xf32> to vector<24x1xf32>
    %71 = vector.broadcast %70 : vector<24x1xf32> to vector<24x256xf32>
    %72 = arith.mulf %69, %71 : vector<24x256xf32>
    %73 = arith.addf %68, %72 : vector<24x256xf32>
    %74 = arith.addf %57, %73 : vector<24x256xf32>
    %cst_31 = arith.constant 0.000000e+00 : f32
    %75 = vector.broadcast %cst_31 : f32 to vector<24x256xf32>
    %c0_32 = arith.constant 0 : index
    %c113 = arith.constant 113 : index
    %76 = vector.load %arg9[%c0_32, %c113] : memref<24x512xf32, #tpu.memory_space<vmem>>, vector<24x256xf32>
    %77 = vector.extract_strided_slice %33 {offsets = [0, 2], sizes = [24, 1], strides = [1, 1]} : vector<24x9xf32> to vector<24x1xf32>
    %78 = vector.broadcast %77 : vector<24x1xf32> to vector<24x256xf32>
    %79 = arith.mulf %76, %78 : vector<24x256xf32>
    %80 = arith.addf %75, %79 : vector<24x256xf32>
    %c0_33 = arith.constant 0 : index
    %c129 = arith.constant 129 : index
    %81 = vector.load %arg9[%c0_33, %c129] : memref<24x512xf32, #tpu.memory_space<vmem>>, vector<24x256xf32>
    %82 = vector.extract_strided_slice %33 {offsets = [0, 5], sizes = [24, 1], strides = [1, 1]} : vector<24x9xf32> to vector<24x1xf32>
    %83 = vector.broadcast %82 : vector<24x1xf32> to vector<24x256xf32>
    %84 = arith.mulf %81, %83 : vector<24x256xf32>
    %85 = arith.addf %80, %84 : vector<24x256xf32>
    %c0_34 = arith.constant 0 : index
    %c145 = arith.constant 145 : index
    %86 = vector.load %arg9[%c0_34, %c145] : memref<24x512xf32, #tpu.memory_space<vmem>>, vector<24x256xf32>
    %87 = vector.extract_strided_slice %33 {offsets = [0, 8], sizes = [24, 1], strides = [1, 1]} : vector<24x9xf32> to vector<24x1xf32>
    %88 = vector.broadcast %87 : vector<24x1xf32> to vector<24x256xf32>
    %89 = arith.mulf %86, %88 : vector<24x256xf32>
    %90 = arith.addf %85, %89 : vector<24x256xf32>
    %c15_i32 = arith.constant 15 : i32
    %91 = vector.broadcast %c15_i32 : i32 to vector<1x256xi32>
    %92 = arith.cmpi ne, %32, %91 : vector<1x256xi32>
    %cst_35 = arith.constant 0.000000e+00 : f32
    %93 = vector.shape_cast %92 : vector<1x256xi1> to vector<1x256xi1>
    %94 = vector.broadcast %93 : vector<1x256xi1> to vector<24x256xi1>
    %95 = vector.broadcast %cst_35 : f32 to vector<24x256xf32>
    %96 = arith.select %94, %90, %95 : vector<24x256xi1>, vector<24x256xf32>
    %97 = arith.addf %74, %96 : vector<24x256xf32>
    %c0_36 = arith.constant 0 : index
    %c0_37 = arith.constant 0 : index
    %98 = vector.load %arg5[%c0_36, %c0_37] : memref<24x1xf32, #tpu.memory_space<vmem>>, vector<24x1xf32>
    %99 = vector.broadcast %98 : vector<24x1xf32> to vector<24x256xf32>
    %100 = arith.addf %97, %99 : vector<24x256xf32>
    %cst_38 = arith.constant 0.000000e+00 : f32
    %cst_39 = arith.constant 6.000000e+00 : f32
    %101 = vector.broadcast %cst_38 : f32 to vector<24x256xf32>
    %102 = arith.maximumf %101, %100 : vector<24x256xf32>
    %103 = vector.broadcast %cst_39 : f32 to vector<24x256xf32>
    %104 = arith.minimumf %103, %102 : vector<24x256xf32>
    %c0_40 = arith.constant 0 : index
    %c0_41 = arith.constant 0 : index
    %105 = vector.load %arg6[%c0_40, %c0_41] : memref<4x24xf32, #tpu.memory_space<vmem>>, vector<4x24xf32>
    %cst_42 = arith.constant dense<0.000000e+00> : vector<4x256xf32>
    %106 = tpu.matmul %105, %104, %cst_42 {dimension_numbers = #tpu.dot_dimension_numbers<[1], [0], [0], [1], [0, 0, 1, 1], [], []>} : vector<4x24xf32>, vector<24x256xf32>, vector<4x256xf32> -> vector<4x256xf32>
    %c0_43 = arith.constant 0 : index
    %c0_44 = arith.constant 0 : index
    %107 = vector.load %arg7[%c0_43, %c0_44] : memref<4x1xf32, #tpu.memory_space<vmem>>, vector<4x1xf32>
    %108 = vector.broadcast %107 : vector<4x1xf32> to vector<4x256xf32>
    %109 = arith.addf %106, %108 : vector<4x256xf32>
    %110 = vector.shape_cast %109 : vector<4x256xf32> to vector<1x4x256xf32>
    %c0_45 = arith.constant 0 : index
    %c0_46 = arith.constant 0 : index
    %c0_47 = arith.constant 0 : index
    %111 = vector.load %arg8[%c0_45, %c0_46, %c0_47] : memref<1x4x256xf32, #tpu.memory_space<vmem>>, vector<1x4x256xf32>
    tpu.vector_store %arg8[%c0_45, %c0_46, %c0_47], %110 {strides = array<i32>} : memref<1x4x256xf32, #tpu.memory_space<vmem>>, vector<1x4x256xf32>,
    return
  }
  func.func @transform_0(%arg0: i32) -> (i32, i32, i32) {
    %c0_i32 = arith.constant 0 : i32
    %c0_i32_0 = arith.constant 0 : i32
    %c0_i32_1 = arith.constant 0 : i32
    return %arg0, %c0_i32, %c0_i32_0 : i32, i32, i32
  }
  func.func @transform_1(%arg0: i32) -> (i32, i32) {
    %c0_i32 = arith.constant 0 : i32
    %c0_i32_0 = arith.constant 0 : i32
    %c0_i32_1 = arith.constant 0 : i32
    return %c0_i32, %c0_i32_0 : i32, i32
  }
  func.func @transform_2(%arg0: i32) -> (i32, i32) {
    %c0_i32 = arith.constant 0 : i32
    %c0_i32_0 = arith.constant 0 : i32
    %c0_i32_1 = arith.constant 0 : i32
    return %c0_i32, %c0_i32_0 : i32, i32
  }
  func.func @transform_3(%arg0: i32) -> (i32, i32) {
    %c0_i32 = arith.constant 0 : i32
    %c0_i32_0 = arith.constant 0 : i32
    %c0_i32_1 = arith.constant 0 : i32
    return %c0_i32, %c0_i32_0 : i32, i32
  }
  func.func @transform_4(%arg0: i32) -> (i32, i32) {
    %c0_i32 = arith.constant 0 : i32
    %c0_i32_0 = arith.constant 0 : i32
    %c0_i32_1 = arith.constant 0 : i32
    return %c0_i32, %c0_i32_0 : i32, i32
  }
  func.func @transform_5(%arg0: i32) -> (i32, i32) {
    %c0_i32 = arith.constant 0 : i32
    %c0_i32_0 = arith.constant 0 : i32
    %c0_i32_1 = arith.constant 0 : i32
    return %c0_i32, %c0_i32_0 : i32, i32
  }
  func.func @transform_6(%arg0: i32) -> (i32, i32) {
    %c0_i32 = arith.constant 0 : i32
    %c0_i32_0 = arith.constant 0 : i32
    %c0_i32_1 = arith.constant 0 : i32
    return %c0_i32, %c0_i32_0 : i32, i32
  }
  func.func @transform_7(%arg0: i32) -> (i32, i32, i32) {
    %c0_i32 = arith.constant 0 : i32
    %c0_i32_0 = arith.constant 0 : i32
    %c0_i32_1 = arith.constant 0 : i32
    return %arg0, %c0_i32, %c0_i32_0 : i32, i32, i32
  }
}

</mosaic_0001>

<bundles_post_ra>
// kernel: tpu_custom_call.1
= control target key start
LH: loop header
LB: loop body
LE: loop exit
PB: predicated region body
PF: predicated region fallthrough
CT: control target
= control target key end

     0   :  { %12 = vsyncpa [#allocation4], 0  ;;  %s2108_s0 = inlined_call_operand.vmem [shape: f32[2,4,256], index: 0, kind: input, shape index: {}]   ;;  %s2109_s1 = inlined_call_operand.vmem [shape: f32[24,4], index: 1, kind: input, shape index: {}]   ;;  %s2110_s2 = inlined_call_operand.vmem [shape: f32[24,1], index: 2, kind: input, shape index: {}]   ;;  %s2111_s3 = inlined_call_operand.vmem [shape: f32[24,9], index: 3, kind: input, shape index: {}]   ;;  %s2112_s4 = inlined_call_operand.vmem [shape: f32[24,1], index: 4, kind: input, shape index: {}]   ;;  %s2113_s5 = inlined_call_operand.vmem [shape: f32[4,24], index: 5, kind: input, shape index: {}]   ;;  %s2114_s6 = inlined_call_operand.vmem [shape: f32[4,1], index: 6, kind: input, shape index: {}]   ;;  %s2115_s7 = inlined_call_operand.hbm [shape: f32[2,4,256], index: 7, kind: output, shape index: {}]  }
   0x1   :  { %14 = vsyncpa [#allocation4 + $0x1], 0  ;;  %s1505_s24 = smov 0   ;;  %s1507_s25 = smov 0  }
   0x2   :  { %s1509_s26 = smov 0   ;;  %s1511_s27 = smov 0  }
   0x3 LB: > { %s1526_s28 = sadd.s32 4294967295, %s1449_s27   ;;  %s1285_s29 = sadd.s32 4294967294, %s1449_s27   ;;  %s1449_s27 = sphi %s1511_s27, %s2129_s27   ;;  %s1445_s26 = sphi %s1509_s26, %s2128_s26   ;;  %s1441_s25 = sphi %s1507_s25, %s2127_s25   ;;  %s1437_s24 = sphi %s1505_s24, %s2126_s24  }
   0x4   : > { %s1530_s30 = sadd.s32 1, %s1449_s27   ;;  %s179_s8 = sadd.s32 1, %s1445_s26 }
   0x5   : > { %s176_s9 = ssub.s32 %s1449_s27, %s1530_s30  ;;  %p189_p0 = scmp.ne.s32.totalorder %s1445_s26, %s1441_s25 }
   0x6   : > { %p177_p1 = scmp.eq.s32.totalorder %s176_s9, 0  ;;  %p190_p2 = scmp.eq.s32.totalorder %s1526_s28, 1 }
   0x7   : > { %p195_p3 = scmp.ne.s32.totalorder %s1441_s25, %s1437_s24  ;;  %p196_p4 = scmp.eq.s32.totalorder %s1285_s29, 1 }
   0x8   : > { %s1541_s10 = scalar_select %p177_p1, %s1445_s26, %s179_s8  }
   0x9   : > { %p1543_p5 = por %p190_p2, %p189_p0  ;;  %p1547_p6 = por %p196_p4, %p195_p3 }
   0xa   : > { %p1288_p7 = scmp.ge.s32.totalorder %s1449_s27, 1  ;;  %p240_p8 = scmp.lt.s32.totalorder %s1449_s27, 3 }
   0xc   : > { %p241_p9 = pnand %p1288_p7, %p240_p8 }
   0xd   : > { %p272_p10 = scmp.lt.s32.totalorder (!%p241_p9), %s1526_s28, 1  ;;  %s1459_s22 = smov (!%p241_p9), 112  }
   0xe   : > { %244 = sbr.rel (%p241_p9) target bundleno = 750 (0x2ee), region = 48  ;;  %s1462_s29 = smov (!%p241_p9), 17  }
   0xf   : > { %s1463_s8 = smov (!%p241_p9), 16   ;;  %s1464_s9 = smov (!%p241_p9), 15  }
  0x13   : > { %v1556_v0 = vld [vmem:[%s2111_s3] sm:$0xff]  ;;  %v1561_v1 = vld [vmem:[%s2111_s3 + $0x8] sm:$0xff]  ;;  %v289_v2 = vld [vmem:[%s2110_s2 + $0x10] sm:$0xff]  ;;  %v1451_v3 = vmov 3   ;;  %v1452_v4 = vmov 0   ;;  %s273_s19 = scalar_select %p272_p10, %s1526_s28, 1 }
  0x14   : > { %1364 = vset.pattern.permute.xlu0 %v1451_v3  ;;  %1363 = vset.pattern.permute.xlu2 %v1452_v4  ;;  %v1578_v6 = vld [vmem:[%s2111_s3 + $0x10] sm:$0xff]  ;;  %v1453_v7 = vmov 6   ;;  %vm319_vm0 = vcmask 1043456   ;;  %v283_v8 = vld [vmem:[%s2109_s1] sm:$0xff]  ;;  %vm309_vm1 = vcmask 31744   ;;  %v1454_v11 = vmov 1  }
  0x15   : > { %1362 = vset.pattern.permute.xlu1 %v1452_v4  ;;  %467 = vperm.xlu0 %1364, %v1556_v0   ;;  %s1307_s20 = sshll.u32 %s273_s19, 3  ;;  %v284_v12 = vld [vmem:[%s2109_s1 + $0x8] sm:$0xff]  ;;  %v1455_v13 = vmov 5   ;;  %v285_v14 = vld [vmem:[%s2109_s1 + $0x10] sm:$0xff]  ;;  %v1456_v15 = vmov 4   ;;  %v1457_v16 = vmov 8  }
  0x16   : > { %440 = vperm.xlu2 %1363, %v1561_v1   ;;  %302 = vperm.xlu1 %1362, %v289_v2   ;;  %s276_s23 = scalar_lea.vmem %s2108_s0, %s1307_s20  ;;  %v287_v17 = vld [vmem:[%s2110_s2] sm:$0xff]  ;;  %v288_v18 = vld [vmem:[%s2110_s2 + $0x8] sm:$0xff]  ;;  %v1458_v19 = vmov 7   ;;  %vm514_vm2 = vcmask 916480   ;;  %vm596_vm3 = vcmask 785408   ;;  %vm654_vm4 = vcmask 138240  }
  0x17   : > { %v286_v5 = vld [vmem:[%s276_s23] sm:$0xff]  ;;  %s1460_s23 = smov 96   ;;  %vm865_vm7 = vcmask 130048   ;;  %vm1091_vm8 = vcmask 121856   ;;  %vm1159_vm11 = vcmask 195584  }
  0x18   : > { %306 = vst [vmem:[#allocation1] ss:$2 sm:$0xff] %v286_v5  ;;  %v1461_v5 = vmov 2  }
  0x1d   : > { %1369 = vset.pattern.permute.xlu0 %v1453_v7 }
  0x1e   : > { %445 = vperm.xlu2 %1363, %v1578_v6   ;;  %435 = vperm.xlu1 %1362, %v1556_v0  }
  0x1f   : > { %557 = vperm.xlu0 %1369, %v1578_v6   ;;  %v307_v9 = vld.sshfl [vmem:[#allocation1] sm:$0xff pattern:$0x75316420]  ;;  %v308_v10 = vld.sshfl [vmem:[#allocation1 + $0x8] sm:$0xff pattern:$0x75316420] }
  0x20   : > { %1292 = vmatpush.msk.msra.mxu0 %vm319_vm0, %v307_v9  ;;  %1296 = vmatpush.msk.msra.mxu1 %vm319_vm0, %v308_v10 }
  0x21   : > { %1293 = vmatmul.msk.f32.vlgmr.msra.gmra.mxu0 %vm309_vm1, %v283_v8  ;;  %1297 = vmatmul.msk.f32.vlgmr.msra.gmra.mxu1 %vm309_vm1, %v283_v8 }
  0x26   : > { %1366 = vset.pattern.permute.xlu2 %v1451_v3  ;;  %1365 = vset.pattern.permute.xlu1 %v1451_v3 }
  0x27   : > { %1371 = vset.pattern.permute.xlu0 %v1454_v11  ;;  %475 = vperm.xlu2 %1366, %v1578_v6  }
  0x28   : > { %471 = vperm.xlu1 %1365, %v1561_v1   ;;  %684 = vperm.xlu0 %1371, %v1561_v1  }
  0x29   : > { %1294 = vmatmul.msk.f32.gmra.mxu0 %vm309_vm1, %v284_v12  ;;  %1298 = vmatmul.msk.f32.gmra.mxu1 %vm309_vm1, %v284_v12 }
  0x2f   : > { %1368 = vset.pattern.permute.xlu2 %v1453_v7 }
  0x30   : > { %1367 = vset.pattern.permute.xlu1 %v1453_v7  ;;  %1375 = vset.pattern.permute.xlu0 %v1455_v13 }
  0x31   : > { %553 = vperm.xlu2 %1368, %v1561_v1   ;;  %549 = vperm.xlu1 %1367, %v1556_v0  }
  0x32   : > { %919 = vperm.xlu0 %1375, %v1561_v1   ;;  %1295 = vmatmul.msk.f32.gmra.mxu0 %vm309_vm1, %v285_v14 }
  0x33   : > { %1299 = vmatmul.msk.f32.gmra.mxu1 %vm309_vm1, %v285_v14 }
  0x39   : > { %1370 = vset.pattern.permute.xlu2 %v1454_v11  ;;  %1372 = vset.pattern.permute.xlu1 %v1456_v15 }
  0x3a   : > { %1380 = vset.pattern.permute.xlu0 %v1457_v16  ;;  %680 = vperm.xlu2 %1370, %v1556_v0  }
  0x3b   : > { %718 = vperm.xlu1 %1372, %v1578_v6   ;;  %991 = vperm.xlu0 %1380, %v1561_v1  }
  0x42   : > { %1373 = vset.pattern.permute.xlu2 %v1455_v13 }
  0x43   : > { %714 = vperm.xlu1 %1372, %v1561_v1   ;;  %1381 = vset.pattern.permute.xlu0 %v1452_v4 }
  0x44   : > { %923 = vperm.xlu2 %1373, %v1578_v6   ;;  %292 = vperm.xlu0 %1381, %v287_v17  }
  0x4b   : > { %1376 = vset.pattern.permute.xlu1 %v1457_v16 }
  0x4c   : > { %1374 = vset.pattern.permute.xlu2 %v1458_v19  ;;  %995 = vperm.xlu1 %1376, %v1578_v6  }
  0x4d   : > { %775 = vperm.xlu2 %1374, %v1578_v6   ;;  %297 = vperm.xlu0 %1381, %v288_v18  }
  0x54   : > { %1378 = vset.pattern.permute.xlu1 %v1458_v19 }
  0x55   : > { %1377 = vset.pattern.permute.xlu2 %v1456_v15  ;;  %771 = vperm.xlu1 %1378, %v1561_v1  }
  0x56   : > { %710 = vperm.xlu2 %1377, %v1556_v0  }
  0x5d   : > { %767 = vperm.xlu1 %1378, %v1556_v0  }
  0x5e   : > { %1379 = vset.pattern.permute.xlu2 %v1455_v13 }
  0x5f   : > { %915 = vperm.xlu2 %1379, %v1556_v0  }
  0x65   : > { %1383 = vset.pattern.permute.xlu1 %v1454_v11 }
  0x67   : > { %1382 = vset.pattern.permute.xlu2 %v1457_v16 }
  0x68   : > { %987 = vperm.xlu2 %1382, %v1556_v0  }
  0x70   : > { %v1625_v20 = vpop.permute.xlu2 %440  ;;  %1386 = vset.pattern.permute.xlu2 %v1452_v4 }
  0x78   : > { %v1628_v21 = vpop.permute.xlu2 %445 }
  0x81   : > { %v1630_v22 = vpop.permute.xlu2 %475 }
  0x82   : > { %v484_v34 = vmul.f32 0.0, %v1630_v22 }
  0x87   : > { %v468_v23 = vpop.permute.xlu0 %467 }
  0x88   : > { %v478_v24 = vmul.f32 0.0, %v468_v23  ;;  %v1632_v25 = vpop.permute.xlu1 %302 }
  0x8a   : > { %496 = vrot.lane.b32.xlu1 %v478_v24, %s1459_s22 }
  0x8b   : > { %v1635_v26 = vpop.permute.xlu2 %553 }
  0x8c   : > { %v565_v41 = vmul.f32 0.0, %v1635_v26 }
  0x90   : > { %v1637_v27 = vpop.permute.xlu1 %435 }
  0x91   : > { %v1639_v28 = vpop.permute.xlu0 %557 }
  0x92   : > { %v568_v49 = vmul.f32 0.0, %v1639_v28 }
  0x94   : > { %v1641_v29 = vpop.permute.xlu2 %680 }
  0x9a   : > { %v472_v30 = vpop.permute.xlu1 %471  ;;  %v1643_v31 = vpop.permute.xlu0 %684 }
  0x9b   : > { %v481_v32 = vmul.f32 0.0, %v472_v30 }
  0x9d   : > { %502 = vrot.lane.b32.xlu1 %v481_v32, %s1459_s22 }
  0x9e   : > { %v1646_v33 = vpop.permute.xlu2 %923  ;;  %v367_v42 = vpop.f32.mrf.mxu1 }
  0x9f   : > { %v341_v43 = vpop.f32.mrf.mxu0  ;;  %v934_v11 = vmul.f32 0.0, %v1646_v33 }
  0xa3   : > { %v550_v37 = vpop.permute.xlu1 %549 }
  0xa4   : > { %v1649_v35 = vpop.permute.xlu0 %919  ;;  %v562_v39 = vmul.f32 0.0, %v550_v37 }
  0xa5   : > { %508 = vrot.lane.b32.xlu1 %v484_v34, %s1459_s22 }
  0xa6   : > { %v370_v54 = vpop.f32.mrf.mxu1 }
  0xa7   : > { %v1652_v36 = vpop.permute.xlu2 %775  ;;  %v344_v56 = vpop.f32.mrf.mxu0 }
  0xa8   : > { %v786_v38 = vmul.f32 0.0, %v1652_v36 }
  0xaa   : > { %812 = vrot.lane.b32.xlu0 %v786_v38, %s1460_s23  ;;  %v931_v38 = vmul.f32 0.0, %v1649_v35 }
  0xad   : > { %v1656_v40 = vpop.permute.xlu0 %991  ;;  %582 = vrot.lane.b32.xlu1 %v562_v39, %s1460_s23  ;;  %v719_v3 = vpop.permute.xlu1 %718 }
  0xaf   : > { %v347_v17 = vpop.f32.mrf.mxu0 }
  0xb0   : > { %v373_v9 = vpop.f32.mrf.mxu1 }
  0xb1   : > { %v374_v10 = vadd.f32 %v373_v9, %v1632_v25 }
  0xb3   : > { %v381_v14 = vmax.f32 %v374_v10, 0.0 }
  0xb5   : > { %588 = vrot.lane.b32.xlu1 %v565_v41, %s1460_s23  ;;  %v715_v12 = vpop.permute.xlu1 %714  ;;  %v1694_v15 = vmin.f32 %v381_v14, 6.0 }
  0xb6   : > { %v293_v44 = vpop.permute.xlu0 %292 }
  0xb7   : > { %v342_v45 = vadd.f32 %v341_v43, %v293_v44  ;;  %v368_v46 = vadd.f32 %v367_v42, %v293_v44  ;;  %v486_v19 = vmul.f32 %v1630_v22, %v1694_v15  ;;  %v933_v42 = vmul.f32 %v1646_v33, %v1694_v15  ;;  %v711_v43 = vpop.permute.xlu2 %710 }
  0xb9   : > { %v376_v47 = vmax.f32 %v342_v45, 0.0  ;;  %v377_v48 = vmax.f32 %v368_v46, 0.0 }
  0xbb   : > { %v1662_v50 = vmin.f32 %v376_v47, 6.0  ;;  %v1664_v51 = vmin.f32 %v377_v48, 6.0 }
  0xbd   : > { %594 = vrot.lane.b32.xlu1 %v568_v49, %s1460_s23  ;;  %v480_v52 = vmul.f32 %v468_v23, %v1664_v51  ;;  %v479_v53 = vmul.f32 %v468_v23, %v1662_v50  ;;  %v561_v62 = vmul.f32 %v550_v37, %v1664_v51  ;;  %v560_v16 = vmul.f32 %v550_v37, %v1662_v50 }
  0xbe   : > { %v348_v23 = vadd.f32 %v347_v17, %v1632_v25  ;;  %v996_v34 = vpop.permute.xlu1 %995 }
  0xbf   : > { %v298_v55 = vpop.permute.xlu0 %297  ;;  %500 = vrot.lane.b32.xlu0 %v480_v52, %s1459_s22  ;;  %498 = vrot.lane.b32.xlu2 %v479_v53, %s1459_s22  ;;  %v1005_v48 = vmul.f32 %v996_v34, %v1694_v15  ;;  %v916_v49 = vpop.permute.xlu2 %915  ;;  %v722_v53 = vmul.f32 %v711_v43, %v1664_v51 }
  0xc0   : > { %v371_v57 = vadd.f32 %v370_v54, %v298_v55  ;;  %v345_v58 = vadd.f32 %v344_v56, %v298_v55  ;;  %v380_v24 = vmax.f32 %v348_v23, 0.0  ;;  %v928_v55 = vmul.f32 0.0, %v916_v49 }
  0xc1   : > { %v450_v23 = vmul.f32 %v1637_v27, %v1664_v51 }
  0xc2   : > { %v379_v59 = vmax.f32 %v371_v57, 0.0  ;;  %v378_v61 = vmax.f32 %v345_v58, 0.0  ;;  %v1710_v32 = vmin.f32 %v380_v24, 6.0 }
  0xc4   : > { %v1671_v60 = vmin.f32 %v379_v59, 6.0  ;;  %v1678_v2 = vmin.f32 %v378_v61, 6.0  ;;  %v784_v25 = vmul.f32 %v1652_v36, %v1710_v32  ;;  %v485_v37 = vmul.f32 %v1630_v22, %v1710_v32 }
  0xc5   : > { %688 = vperm.xlu1 %1383, %v1578_v6   ;;  %v566_v41 = vmul.f32 %v1639_v28, %v1710_v32  ;;  %v1006_v22 = vmul.f32 0.0, %v996_v34  ;;  %v725_v44 = vmul.f32 %v719_v3, %v1710_v32  ;;  %v932_v47 = vmul.f32 %v1646_v33, %v1710_v32 }
  0xc6   : > { %v483_v63 = vmul.f32 %v472_v30, %v1671_v60  ;;  %v482_v7 = vmul.f32 %v472_v30, %v1678_v2  ;;  %v564_v8 = vmul.f32 %v1635_v26, %v1671_v60  ;;  %v563_v13 = vmul.f32 %v1635_v26, %v1678_v2 }
  0xc7   : > { %580 = vrot.lane.b32.xlu2 %v561_v62, %s1460_s23  ;;  %v723_v18 = vmul.f32 %v715_v12, %v1678_v2  ;;  %v929_v26 = vmul.f32 %v1649_v35, %v1678_v2  ;;  %v567_v30 = vmul.f32 %v1639_v28, %v1694_v15  ;;  %v772_v39 = vpop.permute.xlu1 %771  ;;  %v930_v45 = vmul.f32 %v1649_v35, %v1671_v60  ;;  %v1750_v33 = vpop.permute.xlu2 %987 }
  0xc8   : > { %506 = vrot.lane.b32.xlu0 %v483_v63, %s1459_s22  ;;  %v781_v28 = vmul.f32 %v772_v39, %v1678_v2  ;;  %v785_v35 = vmul.f32 %v1652_v36, %v1694_v15  ;;  %v1004_v56 = vmul.f32 %v996_v34, %v1710_v32  ;;  %v783_v57 = vmul.f32 0.0, %v772_v39 }
  0xc9   : > { %v1003_v62 = vmul.f32 0.0, %v1656_v40  ;;  %v721_v63 = vmul.f32 %v711_v43, %v1662_v50  ;;  %v1002_v9 = vmul.f32 %v1656_v40, %v1671_v60  ;;  %v1000_v14 = vmul.f32 0.0, %v1750_v33 }
  0xca   : > { %v453_v43 = vmul.f32 %v1625_v20, %v1671_v60 }
  0xcd   : > { %1384 = vset.pattern.permute.xlu1 %v1461_v5 }
  0xce   : > { %893 = vperm.xlu1 %1384, %v1578_v6   ;;  %v724_v6 = vmul.f32 %v715_v12, %v1671_v60 }
  0xcf   : > { %504 = vrot.lane.b32.xlu2 %v482_v7, %s1459_s22  ;;  %v1733_v46 = vpop.permute.xlu1 %767 }
  0xd0   : > { %586 = vrot.lane.b32.xlu0 %v564_v8, %s1460_s23  ;;  %v780_v7 = vmul.f32 0.0, %v1733_v46  ;;  %v782_v8 = vmul.f32 %v772_v39, %v1671_v60  ;;  %v779_v17 = vmul.f32 %v1733_v46, %v1664_v51 }
  0xd6   : > { %960 = vrot.lane.b32.xlu1 %v934_v11, %s1459_s22 }
  0xd7   : > { %584 = vrot.lane.b32.xlu2 %v563_v13, %s1460_s23 }
  0xd8   : > { %739 = vrot.lane.b32.xlu0 %v724_v6, %s1459_s22  ;;  %v926_v6 = vmul.f32 %v916_v49, %v1662_v50 }
  0xde   : > { %578 = vrot.lane.b32.xlu1 %v560_v16, %s1460_s23  ;;  %v451_v16 = vmul.f32 0.0, %v1625_v20 }
  0xdf   : > { %737 = vrot.lane.b32.xlu2 %v723_v18, %s1459_s22 }
  0xe0   : > { %512 = vrot.lane.b32.xlu0 %v486_v19, %s1459_s22 }
  0xe6   : > { %889 = vperm.xlu1 %1384, %v1561_v1   ;;  %v726_v1 = vmul.f32 %v719_v3, %v1694_v15  ;;  %v927_v3 = vmul.f32 %v916_v49, %v1664_v51 }
  0xe7   : > { %950 = vrot.lane.b32.xlu2 %v929_v26, %s1459_s22 }
  0xe8   : > { %592 = vrot.lane.b32.xlu0 %v567_v30, %s1460_s23 }
  0xee   : > { %808 = vrot.lane.b32.xlu1 %v784_v25, %s1460_s23 }
  0xef   : > { %510 = vrot.lane.b32.xlu2 %v485_v37, %s1459_s22 }
  0xf0   : > { %743 = vrot.lane.b32.xlu0 %v726_v1, %s1459_s22  ;;  %v1001_v1 = vmul.f32 %v1656_v40, %v1678_v2  ;;  %v778_v40 = vmul.f32 %v1733_v46, %v1662_v50 }
  0xf6   : > { %954 = vrot.lane.b32.xlu1 %v931_v38, %s1459_s22  ;;  %v999_v38 = vmul.f32 %v1750_v33, %v1664_v51 }
  0xf7   : > { %590 = vrot.lane.b32.xlu2 %v566_v41, %s1460_s23 }
  0xf8   : > { %958 = vrot.lane.b32.xlu0 %v933_v42, %s1459_s22 }
  0xfc   : > { %v497_v52 = vpop.permute.xlu1 %496 }
  0xfe   : > { %1032 = vrot.lane.b32.xlu1 %v1006_v22, %s1460_s23 }
  0xff   : > { %741 = vrot.lane.b32.xlu2 %v725_v44, %s1459_s22  ;;  %v452_v44 = vmul.f32 %v1625_v20, %v1678_v2 }
 0x100   : > { %952 = vrot.lane.b32.xlu0 %v930_v45, %s1459_s22 }
 0x106   : > { %802 = vrot.lane.b32.xlu1 %v781_v28, %s1460_s23 }
 0x107   : > { %956 = vrot.lane.b32.xlu2 %v932_v47, %s1459_s22 }
 0x108   : > { %1030 = vrot.lane.b32.xlu0 %v1005_v48, %s1460_s23 }
 0x10e   : > { %885 = vperm.xlu1 %1384, %v1556_v0   ;;  %v448_v0 = vmul.f32 0.0, %v1637_v27 }
 0x10f   : > { %v503_v54 = vpop.permute.xlu1 %502  ;;  %810 = vrot.lane.b32.xlu2 %v785_v35, %s1460_s23 }
 0x110   : > { %735 = vrot.lane.b32.xlu0 %v722_v53, %s1459_s22 }
 0x116   : > { %948 = vrot.lane.b32.xlu1 %v928_v55, %s1459_s22  ;;  %v696_v55 = vmul.f32 %v1643_v31, %v1671_v60 }
 0x117   : > { %v1754_v58 = vpop.permute.xlu1 %508  ;;  %1028 = vrot.lane.b32.xlu2 %v1004_v56, %s1460_s23  ;;  %1385 = vset.pattern.permute.xlu1 %v1452_v4 }
 0x118   : > { %806 = vrot.lane.b32.xlu0 %v783_v57, %s1460_s23 }
 0x119   : > { %v1760_v36 = vpop.permute.xlu2 %498 }
 0x11a   : > { %v515_v59 = vsel %vm514_vm2, %v497_v52, %v1760_v36 }
 0x11b   : > { %v1764_v61 = vadd.f32 %v515_v59, %v448_v0  ;;  %v695_v0 = vmul.f32 %v1643_v31, %v1678_v2 }
 0x11c   : > { %v1780_v11 = vpop.permute.xlu0 %812 }
 0x11e   : > { %1026 = vrot.lane.b32.xlu1 %v1003_v62, %s1460_s23 }
 0x11f   : > { %v583_v4 = vpop.permute.xlu1 %582  ;;  %733 = vrot.lane.b32.xlu2 %v721_v63, %s1459_s22 }
 0x120   : > { %946 = vrot.lane.b32.xlu0 %v927_v3, %s1459_s22 }
 0x121   : > { %v1772_v5 = vpop.permute.xlu2 %580 }
 0x122   : > { %v598_v25 = vsel %vm596_vm3, %v1772_v5, %v583_v4  ;;  %v449_v4 = vmul.f32 %v1637_v27, %v1662_v50  ;;  %v456_v27 = vmul.f32 %v1628_v21, %v1694_v15 }
 0x126   : > { %800 = vrot.lane.b32.xlu1 %v780_v7, %s1460_s23 }
 0x127   : > { %v589_v10 = vpop.permute.xlu1 %588  ;;  %804 = vrot.lane.b32.xlu2 %v782_v8, %s1460_s23 }
 0x128   : > { %1024 = vrot.lane.b32.xlu0 %v1002_v9, %s1460_s23 }
 0x129   : > { %v505_v12 = vpop.permute.xlu2 %504 }
 0x12a   : > { %v517_v13 = vsel %vm514_vm2, %v503_v54, %v505_v12  ;;  %v998_v54 = vmul.f32 %v1750_v33, %v1662_v50 }
 0x12b   : > { %v533_v19 = vadd.f32 %v517_v13, %v451_v16 }
 0x12e   : > { %1020 = vrot.lane.b32.xlu1 %v1000_v14, %s1460_s23 }
 0x12f   : > { %v1790_v18 = vpop.permute.xlu1 %594  ;;  %944 = vrot.lane.b32.xlu2 %v926_v6, %s1459_s22  ;;  %s1407_s22 = scalar_lea.hbm %s2115_s7, 16 }
 0x130   : > { %798 = vrot.lane.b32.xlu0 %v779_v17, %s1460_s23 }
 0x131   : > { %v501_v24 = vpop.permute.xlu0 %500  ;;  %v585_v26 = vpop.permute.xlu2 %584 }
 0x132   : > { %v532_v30 = vadd.f32 %v501_v24, %v450_v23  ;;  %v1796_v34 = vadd.f32 %v585_v26, %v533_v19  ;;  %v516_v3 = vsel %vm514_vm2, %v1760_v36, %v501_v24  ;;  %v455_v36 = vmul.f32 %v1628_v21, %v1710_v32 }
 0x133   : > { %v531_v7 = vadd.f32 %v516_v3, %v449_v4 }
 0x134   : > { %v614_v37 = vadd.f32 %v598_v25, %v532_v30 }
 0x136   : > { %640 = vrot.lane.b32.xlu1 %v614_v37, %s1462_s29 }
 0x137   : > { %v1805_v39 = vpop.permute.xlu1 %688  ;;  %1022 = vrot.lane.b32.xlu2 %v1001_v1, %s1460_s23 }
 0x138   : > { %1018 = vrot.lane.b32.xlu0 %v999_v38, %s1460_s23  ;;  %v699_v1 = vmul.f32 %v1805_v39, %v1694_v15 }
 0x139   : > { %v1809_v41 = vpop.permute.xlu2 %737 }
 0x13a   : > { %v507_v42 = vpop.permute.xlu0 %506 }
 0x13b   : > { %v518_v22 = vsel %vm514_vm2, %v505_v12, %v507_v42  ;;  %v535_v48 = vadd.f32 %v507_v42, %v453_v43 }
 0x13c   : > { %v534_v47 = vadd.f32 %v518_v22, %v452_v44 }
 0x13f   : > { %796 = vrot.lane.b32.xlu2 %v778_v40, %s1460_s23 }
 0x140   : > { %v1819_v45 = vpop.permute.xlu1 %893 }
 0x141   : > { %v1821_v28 = vpop.permute.xlu2 %950  ;;  %v904_v44 = vmul.f32 %v1819_v45, %v1694_v15 }
 0x142   : > { %v587_v49 = vpop.permute.xlu0 %586 }
 0x143   : > { %v599_v52 = vsel %vm596_vm3, %v585_v26, %v587_v49  ;;  %v600_v35 = vsel %vm596_vm3, %v587_v49, %v589_v10 }
 0x144   : > { %v1825_v46 = vadd.f32 %v599_v52, %v534_v47  ;;  %v1827_v53 = vadd.f32 %v600_v35, %v535_v48 }
 0x147   : > { %1016 = vrot.lane.b32.xlu2 %v998_v54, %s1460_s23  ;;  %s269_s23 = sand.u32 1, %s1441_s25  }
 0x148   : > { %v961_v20 = vpop.permute.xlu1 %960 }
 0x149   : > { %v511_v56 = vpop.permute.xlu2 %510 }
 0x14a   : > { %v740_v57 = vpop.permute.xlu0 %739  ;;  %v1838_v59 = vsel %vm514_vm2, %v1754_v58, %v511_v56 }
 0x14b   : > { %v746_v62 = vsel %vm514_vm2, %v1809_v41, %v740_v57  ;;  %v1842_v63 = vadd.f32 %v740_v57, %v696_v55 }
 0x14c   : > { %v1844_v33 = vadd.f32 %v746_v62, %v695_v0 }
 0x150   : > { %v579_v8 = vpop.permute.xlu1 %578 }
 0x151   : > { %v597_v9 = vsel %vm596_vm3, %v579_v8, %v1772_v5  ;;  %v612_v58 = vadd.f32 %v579_v8, %v1764_v61  ;;  %v1853_v10 = vpop.permute.xlu2 %590 }
 0x152   : > { %v613_v12 = vadd.f32 %v597_v9, %v531_v7  ;;  %v513_v13 = vpop.permute.xlu0 %512  ;;  %v694_v7 = vmul.f32 0.0, %v1643_v31  ;;  %v691_v9 = vmul.f32 0.0, %v1641_v29 }
 0x153   : > { %v520_v14 = vsel %vm514_vm2, %v511_v56, %v513_v13  ;;  %636 = vrot.lane.b32.xlu2 %v612_v58, %s1462_s29  ;;  %v538_v17 = vadd.f32 %v513_v13, %v456_v27 }
 0x154   : > { %638 = vrot.lane.b32.xlu0 %v613_v12, %s1462_s29  ;;  %v537_v61 = vadd.f32 %v520_v14, %v455_v36  ;;  %v760_v8 = vadd.f32 %v1809_v41, %v694_v7  ;;  %v697_v41 = vmul.f32 0.0, %v1805_v39 }
 0x158   : > { %v890_v6 = vpop.permute.xlu1 %889 }
 0x159   : > { %v899_v5 = vmul.f32 0.0, %v890_v6  ;;  %v1862_v16 = vpop.permute.xlu2 %741  ;;  %v900_v0 = vmul.f32 %v890_v6, %v1678_v2  ;;  %v901_v15 = vmul.f32 %v890_v6, %v1671_v60 }
 0x15a   : > { %v593_v19 = vpop.permute.xlu0 %592  ;;  %v763_v6 = vadd.f32 %v1862_v16, %v697_v41 }
 0x15b   : > { %v601_v23 = vsel %vm596_vm3, %v1853_v10, %v593_v19  ;;  %v602_v24 = vsel %vm596_vm3, %v593_v19, %v1790_v18  ;;  %v1869_v26 = vadd.f32 %v1821_v28, %v899_v5  ;;  %v903_v18 = vmul.f32 %v1819_v45, %v1710_v32 }
 0x15c   : > { %v1871_v30 = vadd.f32 %v601_v23, %v537_v61  ;;  %v1873_v25 = vadd.f32 %v602_v24, %v538_v17  ;;  %v902_v17 = vmul.f32 0.0, %v1819_v45 }
 0x160   : > { %v1875_v37 = vpop.permute.xlu1 %808 }
 0x161   : > { %v957_v38 = vpop.permute.xlu2 %956  ;;  %v835_v5 = vadd.f32 %v1875_v37, %v763_v6 }
 0x162   : > { %v744_v42 = vpop.permute.xlu0 %743  ;;  %v983_v24 = vadd.f32 %v957_v38, %v902_v17 }
 0x163   : > { %v765_v22 = vadd.f32 %v744_v42, %v699_v1 }
 0x168   : > { %v955_v40 = vpop.permute.xlu1 %954 }
 0x169   : > { %v811_v43 = vpop.permute.xlu2 %810 }
 0x16a   : > { %v959_v47 = vpop.permute.xlu0 %958  ;;  %v819_v48 = vsel %vm596_vm3, %v811_v43, %v1780_v11 }
 0x16b   : > { %v966_v49 = vsel %vm514_vm2, %v957_v38, %v959_v47  ;;  %v967_v52 = vsel %vm514_vm2, %v959_v47, %v961_v20  ;;  %v1887_v35 = vadd.f32 %v819_v48, %v765_v22  ;;  %v747_v38 = vsel %vm514_vm2, %v1862_v16, %v744_v42 }
 0x16c   : > { %v984_v54 = vadd.f32 %v966_v49, %v903_v18  ;;  %v1889_v55 = vadd.f32 %v967_v52, %v904_v44  ;;  %v698_v48 = vmul.f32 %v1805_v39, %v1710_v32  ;;  %v818_v49 = vsel %vm596_vm3, %v1875_v37, %v811_v43 }
 0x16e   : > { %v764_v52 = vadd.f32 %v747_v38, %v698_v48 }
 0x170   : > { %v1891_v56 = vpop.permute.xlu1 %1032 }
 0x171   : > { %v1029_v57 = vpop.permute.xlu2 %1028 }
 0x172   : > { %v953_v62 = vpop.permute.xlu0 %952  ;;  %v1055_v1 = vadd.f32 %v1029_v57, %v983_v24 }
 0x173   : > { %v964_v11 = vsel %vm514_vm2, %v1821_v28, %v953_v62  ;;  %v965_v3 = vsel %vm514_vm2, %v953_v62, %v955_v40 }
 0x174   : > { %v1898_v4 = vadd.f32 %v964_v11, %v900_v0  ;;  %v1900_v20 = vadd.f32 %v965_v3, %v901_v15 }
 0x178   : > { %v803_v58 = vpop.permute.xlu1 %802 }
 0x179   : > { %v832_v2 = vadd.f32 %v803_v58, %v760_v8  ;;  %v734_v12 = vpop.permute.xlu2 %733 }
 0x17a   : > { %v1031_v60 = vpop.permute.xlu0 %1030  ;;  %v1905_v13 = vadd.f32 %v734_v12, %v691_v9 }
 0x17b   : > { %v1038_v28 = vsel %vm596_vm3, %v1029_v57, %v1031_v60  ;;  %853 = vrot.lane.b32.xlu2 %v832_v2, %s1463_s8  ;;  %v1039_v62 = vsel %vm596_vm3, %v1031_v60, %v1891_v56 }
 0x17c   : > { %v1909_v14 = vadd.f32 %v1038_v28, %v984_v54  ;;  %v836_v54 = vadd.f32 %v818_v49, %v764_v52 }
 0x180   : > { %v1911_v36 = vpop.permute.xlu1 %885 }
 0x181   : > { %v805_v31 = vpop.permute.xlu2 %804  ;;  %v896_v8 = vmul.f32 0.0, %v1911_v36  ;;  %v897_v41 = vmul.f32 %v1911_v36, %v1662_v50  ;;  %v898_v6 = vmul.f32 %v1911_v36, %v1664_v51  ;;  %v1153_v36 = vld [vmem:[%s2114_s6] sm:$0xf] }
 0x182   : > { %v736_v27 = vpop.permute.xlu0 %735  ;;  %v816_v11 = vsel %vm596_vm3, %v803_v58, %v805_v31 }
 0x183   : > { %642 = vrot.lane.b32.xlu2 %v1796_v34, %s1462_s29  ;;  %v454_v34 = vmul.f32 0.0, %v1628_v21  ;;  %v745_v21 = vsel %vm514_vm2, %v734_v12, %v736_v27  ;;  %v833_v7 = vadd.f32 %v816_v11, %v1844_v33 }
 0x185   : > { %v536_v40 = vadd.f32 %v1838_v59, %v454_v34  ;;  %v693_v59 = vmul.f32 %v1641_v29, %v1664_v51  ;;  %v1117_v51 = vld [vmem:[%s2112_s4 + $0x8] sm:$0xff] }
 0x187   : > { %v618_v47 = vadd.f32 %v1853_v10, %v536_v40  ;;  %v692_v10 = vmul.f32 %v1641_v29, %v1662_v50  ;;  %v759_v15 = vadd.f32 %v736_v27, %v693_v59  ;;  %v1057_v29 = vadd.f32 %v1039_v62, %v1889_v55 }
 0x188   : > { %v1920_v19 = vpop.permute.xlu1 %948 }
 0x189   : > { %v1922_v23 = vpop.permute.xlu2 %944  ;;  %v758_v0 = vadd.f32 %v745_v21, %v692_v10  ;;  %v394_v21 = vlaneseq }
 0x18a   : > { %v807_v61 = vpop.permute.xlu0 %806 }
 0x18b   : > { %859 = vrot.lane.b32.xlu2 %v835_v5, %s1463_s8  ;;  %v817_v3 = vsel %vm596_vm3, %v805_v31, %v807_v61 }
 0x18c   : > { %v834_v55 = vadd.f32 %v817_v3, %v1842_v63 }
 0x190   : > { %v1027_v18 = vpop.permute.xlu1 %1026 }
 0x191   : > { %v1023_v44 = vpop.permute.xlu2 %1022 }
 0x192   : > { %v1924_v22 = vpop.permute.xlu0 %946  ;;  %v1052_v56 = vadd.f32 %v1023_v44, %v1869_v26 }
 0x193   : > { %1085 = vrot.lane.b32.xlu2 %v1055_v1, %s1464_s9 }
 0x198   : > { %v801_v57 = vpop.permute.xlu1 %800 }
 0x199   : > { %v797_v16 = vpop.permute.xlu2 %796 }
 0x19a   : > { %v1025_v45 = vpop.permute.xlu0 %1024  ;;  %v829_v50 = vadd.f32 %v797_v16, %v1905_v13 }
 0x19b   : > { %648 = vrot.lane.b32.xlu2 %v618_v47, %s1462_s29  ;;  %v1037_v58 = vsel %vm596_vm3, %v1025_v45, %v1027_v18 }
 0x19c   : > { %v1054_v63 = vadd.f32 %v1037_v58, %v1900_v20  ;;  %v1116_v20 = vld [vmem:[%s2112_s4] sm:$0xff] }
 0x1a0   : > { %v1021_v2 = vpop.permute.xlu1 %1020 }
 0x1a1   : > { %v1017_v9 = vpop.permute.xlu2 %1016 }
 0x1a2   : > { %v799_v42 = vpop.permute.xlu0 %798 }
 0x1a3   : > { %v814_v32 = vsel %vm596_vm3, %v797_v16, %v799_v42  ;;  %v815_v39 = vsel %vm596_vm3, %v799_v42, %v801_v57  ;;  %861 = vrot.lane.b32.xlu2 %v836_v54, %s1463_s8  ;;  %v395_v57 = vand.u32 127, %v394_v21 }
 0x1a4   : > { %v830_v37 = vadd.f32 %v814_v32, %v758_v0  ;;  %v831_v43 = vadd.f32 %v815_v39, %v759_v15 }
 0x1a5   : > { %v396_v0 = vadd.s32 128, %v395_v57  ;;  %v401_v32 = vand.u32 15, %v395_v57 }
 0x1a6   : > { %851 = vrot.lane.b32.xlu1 %v831_v43, %s1463_s8  ;;  %849 = vrot.lane.b32.xlu0 %v830_v37, %s1463_s8 }
 0x1a7   : > { %v408_v39 = vand.u32 15, %v396_v0  ;;  %vm2016_vm5 = vcmp.ne.s32.totalorder %v401_v32, 0  ;;  %vm2036_vm9 = vcmp.ne.s32.totalorder %v401_v32, 15 }
 0x1a8   : > { %v641_v60 = vpop.permute.xlu1 %640 }
 0x1a9   : > { %vm2020_vm6 = vcmp.ne.s32.totalorder %v408_v39, 0  ;;  %vm2040_vm10 = vcmp.ne.s32.totalorder %v408_v39, 15 }
 0x1aa   : > { %v1019_v12 = vpop.permute.xlu0 %1018 }
 0x1ab   : > { %1089 = vrot.lane.b32.xlu2 %v1057_v29, %s1464_s9  ;;  %v1035_v5 = vsel %vm596_vm3, %v1019_v12, %v1021_v2 }
 0x1ad   : > { %v637_v28 = vpop.permute.xlu2 %636 }
 0x1ae   : > { %646 = vrot.lane.b32.xlu1 %v1827_v53, %s1462_s29  ;;  %644 = vrot.lane.b32.xlu0 %v1825_v46, %s1462_s29  ;;  %v977_v46 = vadd.f32 %v1922_v23, %v896_v8  ;;  %v1036_v53 = vsel %vm596_vm3, %v1023_v44, %v1025_v45 }
 0x1af   : > { %v1053_v33 = vadd.f32 %v1036_v53, %v1898_v4 }
 0x1b0   : > { %v1049_v26 = vadd.f32 %v1017_v9, %v977_v46 }
 0x1b3   : > { %1079 = vrot.lane.b32.xlu2 %v1052_v56, %s1464_s9 }
 0x1b6   : > { %857 = vrot.lane.b32.xlu1 %v834_v55, %s1463_s8  ;;  %855 = vrot.lane.b32.xlu0 %v833_v7, %s1463_s8 }
 0x1bb   : > { %1073 = vrot.lane.b32.xlu2 %v1049_v26, %s1464_s9 }
 0x1be   : > { %1083 = vrot.lane.b32.xlu1 %v1054_v63, %s1464_s9  ;;  %1081 = vrot.lane.b32.xlu0 %v1053_v33, %s1464_s9 }
 0x1c3   : > { %1121 = vperm.xlu2 %1386, %v1116_v20  }
 0x1c6   : > { %652 = vrot.lane.b32.xlu1 %v1873_v25, %s1462_s29  ;;  %863 = vrot.lane.b32.xlu0 %v1887_v35, %s1463_s8  ;;  %v639_v27 = vpop.permute.xlu0 %638  ;;  %v962_v25 = vsel %vm514_vm2, %v1922_v23, %v1924_v22  ;;  %v963_v35 = vsel %vm514_vm2, %v1924_v22, %v1920_v19  ;;  %v1118_v19 = vld [vmem:[%s2112_s4 + $0x10] sm:$0xff] }
 0x1c7   : > { %v1977_v31 = vsel %vm654_vm4, %v637_v28, %v639_v27  ;;  %v1980_v4 = vsel %vm654_vm4, %v639_v27, %v641_v60  ;;  %v979_v61 = vadd.f32 %v963_v35, %v898_v6 }
 0x1c8   : > { %v668_v33 = vsel %vm2020_vm6, %v1980_v4, 0.0  ;;  %v667_v28 = vsel %vm2016_vm5, %v1977_v31, 0.0 }
 0x1c9   : > { %v1051_v24 = vadd.f32 %v1035_v5, %v979_v61 }
 0x1ce   : > { %1087 = vrot.lane.b32.xlu1 %v1909_v14, %s1464_s9  ;;  %650 = vrot.lane.b32.xlu0 %v1871_v30, %s1462_s29  ;;  %v1034_v14 = vsel %vm596_vm3, %v1017_v9, %v1019_v12  ;;  %v978_v30 = vadd.f32 %v962_v25, %v897_v41  ;;  %s1289_s29 = sshll.u32 %s269_s23, 3 }
 0x1cf   : > { %s271_s15 = scalar_lea.vmem [#allocation3], %s1289_s29 }
 0x1d0   : > { %v1050_v17 = vadd.f32 %v1034_v14, %v978_v30  ;;  %s1223_s16 = sshll.u32 %s271_s15, 4  ;;  %s1224_s16 = int_to_ptr.vmem [resolvable:$true] %s1223_s16 }
 0x1d5   : > { %v854_v23 = vpop.permute.xlu2 %853 }
 0x1d6   : > { %1077 = vrot.lane.b32.xlu1 %v1051_v24, %s1464_s9  ;;  %1075 = vrot.lane.b32.xlu0 %v1050_v17, %s1464_s9 }
 0x1dd   : > { %v643_v1 = vpop.permute.xlu2 %642 }
 0x1de   : > { %847 = vrot.lane.b32.xlu1 %v829_v50, %s1463_s8  ;;  %1131 = vperm.xlu0 %1381, %v1118_v19   ;;  %s1308_s8 = sshll.u32 %s1526_s28, 3  ;;  %s1210_s28 = scalar_lea.sflag [#allocation4], %s269_s23 }
 0x1df   : > { %s1221_s14 = scalar_lea.hbm %s2115_s7, %s1308_s8 }
 0x1e0   : > { %s1225_s17 = sshll.u32 %s1221_s14, 4  ;;  %s1226_s17 = int_to_ptr.hbm [resolvable:$true] %s1225_s17 }
 0x1e1   : > { %s1401_s18 = sshra.s32 %s1226_s17, 4  ;;  %s1402_s18 = int_to_ptr.hbm [resolvable:$true] %s1401_s18 }
 0x1e2   : > { %s1403_s19 = scalar_lea.hbm %s1402_s18, 8  ;;  %p1408_p0 = scmp.lt.s32.totalorder %s1402_s18, %s2115_s7 }
 0x1e3   : > { %p1404_p11 = scmp.ne.s32.totalorder %s1402_s18, %s1403_s19  ;;  %p1409_p1 = scmp.lt.s32.totalorder %s1407_s22, %s1403_s19 }
 0x1e5   : > { %v860_v22 = vpop.permute.xlu2 %859  ;;  %p1405_p12 = pnand %p1404_p11, %p1543_p5  ;;  %p1410_p2 = por %p1409_p1, %p1408_p0 }
 0x1e6   : > { %1126 = vperm.xlu1 %1385, %v1117_v51   ;;  %1156 = vperm.xlu0 %1381, %v1153_v36  }
 0x1e7   : > { %p1406_p13 = pneg %p1405_p12 }
 0x1e9   : > { %p1411_p3 = pnand %p1410_p2, %p1406_p13 }
 0x1ed   : > { %v1086_v18 = vpop.permute.xlu2 %1085 }
 0x1f5   : > { %v649_v47 = vpop.permute.xlu2 %648 }
 0x1fd   : > { %v862_v48 = vpop.permute.xlu2 %861 }
 0x1fe   : > { %v870_v55 = vsel %vm865_vm7, %v860_v22, %v862_v48 }
 0x205   : > { %v1090_v59 = vpop.permute.xlu2 %1089 }
 0x20d   : > { %v1080_v42 = vpop.permute.xlu2 %1079 }
 0x215   : > { %v1074_v2 = vpop.permute.xlu2 %1073 }
 0x218   : > { %v852_v34 = vpop.permute.xlu1 %851  ;;  %v850_v40 = vpop.permute.xlu0 %849 }
 0x219   : > { %v867_v8 = vsel %vm865_vm7, %v850_v40, %v852_v34 }
 0x21a   : > { %v879_v27 = vadd.f32 %v867_v8, %v668_v33 }
 0x220   : > { %v647_v13 = vpop.permute.xlu1 %646  ;;  %v645_v44 = vpop.permute.xlu0 %644 }
 0x221   : > { %v657_v25 = vsel %vm654_vm4, %v643_v1, %v645_v44  ;;  %v658_v14 = vsel %vm654_vm4, %v645_v44, %v647_v13 }
 0x222   : > { %v669_v36 = vsel %vm2016_vm5, %v657_v25, 0.0 }
 0x228   : > { %v858_v45 = vpop.permute.xlu1 %857  ;;  %v856_v38 = vpop.permute.xlu0 %855 }
 0x229   : > { %v868_v5 = vsel %vm865_vm7, %v854_v23, %v856_v38  ;;  %v869_v1 = vsel %vm865_vm7, %v856_v38, %v858_v45 }
 0x230   : > { %v1084_v49 = vpop.permute.xlu1 %1083  ;;  %v1082_v52 = vpop.permute.xlu0 %1081 }
 0x231   : > { %v1094_v35 = vsel %vm1091_vm8, %v1080_v42, %v1082_v52  ;;  %v1095_v24 = vsel %vm1091_vm8, %v1082_v52, %v1084_v49  ;;  %v1122_v49 = vpop.permute.xlu2 %1121 }
 0x232   : > { %v1106_v23 = vsel %vm2036_vm9, %v1094_v35, 0.0 }
 0x238   : > { %v653_v10 = vpop.permute.xlu1 %652  ;;  %v864_v54 = vpop.permute.xlu0 %863 }
 0x239   : > { %v871_v9 = vsel %vm865_vm7, %v862_v48, %v864_v54  ;;  %v1107_v48 = vsel %vm2040_vm10, %v1095_v24, 0.0 }
 0x240   : > { %v1088_v15 = vpop.permute.xlu1 %1087  ;;  %v651_v16 = vpop.permute.xlu0 %650 }
 0x241   : > { %v659_v37 = vsel %vm654_vm4, %v649_v47, %v651_v16  ;;  %v660_v43 = vsel %vm654_vm4, %v651_v16, %v653_v10  ;;  %v1096_v46 = vsel %vm1091_vm8, %v1086_v18, %v1088_v15  ;;  %v1097_v53 = vsel %vm1091_vm8, %v1088_v15, %v1090_v59 }
 0x242   : > { %v671_v11 = vsel %vm2016_vm5, %v659_v37, 0.0  ;;  %v672_v3 = vsel %vm2020_vm6, %v660_v43, 0.0  ;;  %v1108_v20 = vsel %vm2036_vm9, %v1096_v46, 0.0  ;;  %v1109_v4 = vsel %vm2040_vm10, %v1097_v53, 0.0 }
 0x243   : > { %v882_v58 = vadd.f32 %v870_v55, %v671_v11  ;;  %v883_v26 = vadd.f32 %v871_v9, %v672_v3  ;;  %v880_v47 = vadd.f32 %v868_v5, %v669_v36  ;;  %v1152_v3 = vld [vmem:[%s2113_s5] sm:$0xf] }
 0x245   : > { %v1114_v41 = vadd.f32 %v1108_v20, %v882_v58  ;;  %v1115_v6 = vadd.f32 %v1109_v4, %v883_v26  ;;  %v1112_v59 = vadd.f32 %v1106_v23, %v880_v47 }
 0x248   : > { %v1078_v56 = vpop.permute.xlu1 %1077  ;;  %v1076_v7 = vpop.permute.xlu0 %1075 }
 0x249   : > { %v1093_v60 = vsel %vm1091_vm8, %v1076_v7, %v1078_v56  ;;  %v1092_v30 = vsel %vm1091_vm8, %v1074_v2, %v1076_v7 }
 0x24a   : > { %v1105_v31 = vsel %vm2040_vm10, %v1093_v60, 0.0  ;;  %v1104_v34 = vsel %vm2036_vm9, %v1092_v30, 0.0 }
 0x24b   : > { %v1111_v18 = vadd.f32 %v1105_v31, %v879_v27 }
 0x24d   : > { %v1135_v10 = vadd.f32 %v1122_v49, %v1111_v18 }
 0x24f   : > { %v1141_v42 = vmax.f32 %v1135_v10, 0.0 }
 0x250   : > { %v848_v61 = vpop.permute.xlu1 %847  ;;  %v1132_v17 = vpop.permute.xlu0 %1131 }
 0x251   : > { %v866_v19 = vsel %vm865_vm7, %v848_v61, %v850_v40  ;;  %v1138_v50 = vadd.f32 %v1132_v17, %v1114_v41  ;;  %v1139_v51 = vadd.f32 %v1132_v17, %v1115_v6  ;;  %v670_v40 = vsel %vm2020_vm6, %v658_v14, 0.0 }
 0x252   : > { %v878_v22 = vadd.f32 %v866_v19, %v667_v28  ;;  %v881_v45 = vadd.f32 %v869_v1, %v670_v40  ;;  %v1147_v11 = vmin.f32 %v1141_v42, 6.0 }
 0x253   : > { %v1144_v13 = vmax.f32 %v1138_v50, 0.0  ;;  %v1145_v44 = vmax.f32 %v1139_v51, 0.0 }
 0x254   : > { %v1110_v52 = vadd.f32 %v1104_v34, %v878_v22  ;;  %v1113_v54 = vadd.f32 %v1107_v48, %v881_v45 }
 0x255   : > { %v1150_v38 = vmin.f32 %v1144_v13, 6.0  ;;  %v1151_v21 = vmin.f32 %v1145_v44, 6.0 }
 0x256   : > { %v1134_v57 = vadd.f32 %v1122_v49, %v1110_v52 }
 0x257   : > { %1176 = vmatpush.msra.mxu2 %v1150_v38  ;;  %1196 = vmatpush.msra.mxu3 %v1151_v21 }
 0x258   : > { %v1127_v0 = vpop.permute.xlu1 %1126  ;;  %v1140_v37 = vmax.f32 %v1134_v57, 0.0  ;;  %v1157_v56 = vpop.permute.xlu0 %1156 }
 0x259   : > { %v1136_v15 = vadd.f32 %v1127_v0, %v1112_v59  ;;  %v1137_v16 = vadd.f32 %v1127_v0, %v1113_v54 }
 0x25a   : > { %v1146_v29 = vmin.f32 %v1140_v37, 6.0 }
 0x25b   : > { %v1142_v32 = vmax.f32 %v1136_v15, 0.0  ;;  %v1143_v39 = vmax.f32 %v1137_v16, 0.0 }
 0x25d   : > { %v1148_v43 = vmin.f32 %v1142_v32, 6.0  ;;  %v1149_v62 = vmin.f32 %v1143_v39, 6.0 }
 0x25f   : > { %1177 = vmatpush.msra.mxu2 %v1148_v43  ;;  %1197 = vmatpush.msra.mxu3 %v1149_v62 }
 0x261   : > { %1178 = vmatpush.msra.mxu2 %v1146_v29  ;;  %1198 = vmatpush.msra.mxu3 %v1147_v11 }
 0x262   : > { %1300 = vmatmul.msk.f32.vlgmr.msra.gmra.mxu2 %vm1159_vm11, %v1152_v3  ;;  %1301 = vmatmul.msk.f32.vlgmr.msra.gmra.mxu3 %vm1159_vm11, %v1152_v3 }
 0x2e5   : > { %v1180_v7 = vpop.f32.mrf.mxu2  ;;  %v1200_v55 = vpop.f32.mrf.mxu3 }
 0x2e6   : > { %v1201_v8 = vadd.f32 %v1200_v55, %v1157_v56  ;;  %v1181_v9 = vadd.f32 %v1180_v7, %v1157_v56 }
 0x2e8   : > { %v1205_v46 = vrot.slane %v1201_v8, 4 }
 0x2ea   : > { %v1206_v53 = vsel %vm319_vm0, %v1181_v9, %v1205_v46 }
 0x2eb   : > { %1208 = vst [vmem:[%s271_s15] sm:$0xff] %v1206_v53 }
 0x2ec   : > { %1414 = shalt.err (!%p1411_p3)
}
 0x2ed   : > { %1309 = dma.vmem_to_hbm [thread:$0]  (%p1543_p5), %s1224_s16, 128, %s1226_s17, %s1210_s28  }
 0x2ee PF: > { %p1315_p4 = scmp.ge.s32.totalorder %s1449_s27, 2  ;;  %s1237_s23 = sand.u32 1, %s1437_s24  }
 0x2ef   : > { %s1238_s9 = scalar_lea.sflag [#allocation4], %s1237_s23 }
 0x2f0   : > { %p1312_p7 = pnand %p1315_p4, %p1547_p6 }
 0x2f2   : > { %p1313_p8 = pneg %p1312_p7 }
 0x2f4   : > { %1432 = dma.done.wait (%p1313_p8), %s1238_s9, 128  }
 0x2f5   : > { %1434 = vsyncadd (%p1313_p8), %s1238_s9, 4294967168  ;;  %p17_p9 = scmp.ge.s32.totalorder %s1530_s30, 4   ;;  %s2126_s24 = smov %s1441_s25 }
 0x2f6   : > { %s2127_s25 = smov %s1445_s26  ;;  %s2128_s26 = smov %s1541_s10 }
 0x2f7   : > { %s2129_s27 = smov %s1530_s30  ;;  %19 = sbr.rel (!%p17_p9) target bundleno = 3 (0x3), region = 83 }
 0x2fc   :  { %1244 = vsyncpa [#allocation4], 1 }
 0x2fd   :  { %1246 = vsyncpa [#allocation4 + $0x1], 1 }

</bundles_post_ra>
